<compile_context>
chip_gen: v5e
topology: v5e:2x2
jax: 0.10.0
libtpu: 0.0.40
codegen_flags: <defaults>
</compile_context>

<pallas_src>
import functools

import jax
import jax.numpy as jnp
from jax.experimental import pallas as pl
from jax.experimental.pallas import tpu as pltpu


def _sparsification_kernel(x_ref, w1_ref, b1_ref, w2_ref, b2_ref, o_ref, *, d_out):
    x = x_ref[...]

    # Layer 1, both branches fused along lanes:
    #   h = relu(x @ [Wf1 | Wl1] + [bf1 | bl1])      -> (tile_m, 2*d_in)
    h = jnp.dot(x, w1_ref[...], preferred_element_type=jnp.float32) + b1_ref[...]
    h = jnp.maximum(h, 0.0)

    # Layer 2, block-diagonal fusion:
    #   y = relu(h @ blkdiag(Wf2, Wl2) + [bf2 | bl2]) -> (tile_m, 2*d_out)
    y = jnp.dot(h, w2_ref[...], preferred_element_type=jnp.float32) + b2_ref[...]
    y = jnp.maximum(y, 0.0)

    # features = locations * descriptor
    o_ref[...] = (y[:, d_out:] * y[:, :d_out]).astype(o_ref.dtype)


def _round_up(x, m):
    return (x + m - 1) // m * m


def sparsification(x, params, *, tile_m=2048):
    """x: (B, N, D_in). Returns (B, N, D_out)."""
    wf1, bf1, wf2, bf2, wl1, bl1, wl2, bl2 = params
    B, N, d_in = x.shape
    d_out = wf2.shape[1]
    M = B * N

    # --- fuse branch weights (done once, outside the kernel) ---------------
    w1 = jnp.concatenate([wf1, wl1], axis=1)                        # (d_in, 2*d_in)
    b1 = jnp.concatenate([bf1, bl1], axis=1)                        # (1, 2*d_in)
    z = jnp.zeros((d_in, d_out), wf2.dtype)
    w2 = jnp.concatenate(
        [jnp.concatenate([wf2, z], axis=1),
         jnp.concatenate([z, wl2], axis=1)], axis=0)                # (2*d_in, 2*d_out)
    b2 = jnp.concatenate([bf2, bl2], axis=1)                        # (1, 2*d_out)

    # --- row tiling ---------------------------------------------------------
    # Large tiles amortize per-grid-step overhead; keep tile_m a multiple of 8
    # and pad M so every block is full.
    tile_m = min(tile_m, _round_up(M, 8))
    m_pad = _round_up(M, tile_m)
    x2d = x.reshape(M, d_in)
    if m_pad != M:
        x2d = jnp.pad(x2d, ((0, m_pad - M), (0, 0)))

    grid = (m_pad // tile_m,)
    const = lambda i: (0, 0)  # weights/biases resident across grid steps

    itemsize = jnp.dtype(x.dtype).itemsize
    flops = 2 * M * (d_in * (2 * d_in) + (2 * d_in) * (2 * d_out))
    bytes_accessed = (
        m_pad * d_in * itemsize
        + m_pad * d_out * itemsize
        + (w1.size + b1.size + w2.size + b2.size) * jnp.dtype(w1.dtype).itemsize
    )

    out2d = pl.pallas_call(
        functools.partial(_sparsification_kernel, d_out=d_out),
        out_shape=jax.ShapeDtypeStruct((m_pad, d_out), x.dtype),
        grid=grid,
        in_specs=[
            pl.BlockSpec((tile_m, d_in), lambda i: (i, 0)),  # x: streamed row tiles
            pl.BlockSpec(w1.shape, const),
            pl.BlockSpec(b1.shape, const),
            pl.BlockSpec(w2.shape, const),
            pl.BlockSpec(b2.shape, const),
        ],
        out_specs=pl.BlockSpec((tile_m, d_out), lambda i: (i, 0)),
        compiler_params=pltpu.CompilerParams(
            dimension_semantics=("parallel",),      # shard row tiles across TCs (v7x)
            vmem_limit_bytes=32 * 1024 * 1024,      # safe under v7x 64 MiB / v5e default
        ),
        cost_estimate=pl.CostEstimate(
            flops=flops, transcendentals=0, bytes_accessed=bytes_accessed),
    )(x2d, w1, b1, w2, b2)

    return out2d[:M].reshape(B, N, d_out)


def init_params(key, input_dim, output_dim):
    """Deterministic synthetic parameters. Weights are (in, out)."""
    ks = jax.random.split(key, 8)
    scale_in = 1.0 / jnp.sqrt(input_dim)

    def lin(kw, kb, din, dout):
        w = jax.random.uniform(kw, (din, dout), jnp.float32, -scale_in, scale_in)
        b = jax.random.uniform(kb, (1, dout), jnp.float32, -scale_in, scale_in)
        return w, b

    wl1, bl1 = lin(ks[0], ks[1], input_dim, input_dim)   # location_encoder1
    wl2, bl2 = lin(ks[2], ks[3], input_dim, output_dim)  # location_encoder2
    wf1, bf1 = lin(ks[4], ks[5], input_dim, input_dim)   # feature_encoder1
    wf2, bf2 = lin(ks[6], ks[7], input_dim, output_dim)  # feature_encoder2
    return (wf1, bf1, wf2, bf2, wl1, bl1, wl2, bl2)


def _reference(x, params):
    wf1, bf1, wf2, bf2, wl1, bl1, wl2, bl2 = params
    d = jax.nn.relu(x @ wf1 + bf1[0])
    d = jax.nn.relu(d @ wf2 + bf2[0])
    loc = jax.nn.relu(x @ wl1 + bl1[0])
    loc = jax.nn.relu(loc @ wl2 + bl2[0])
    return loc * d


if __name__ == "__main__":
    key = jax.random.PRNGKey(0)
    k_x, k_p = jax.random.split(key)

    B, N, input_dim, output_dim = 2, 8, 32, 16
    x = jax.random.normal(k_x, (B, N, input_dim), jnp.float32)
    params = init_params(k_p, input_dim, output_dim)

    out = sparsification(x, params)
    out = jax.block_until_ready(out)

    ref = _reference(x, params)
    assert out.shape == (B, N, output_dim)
    assert jnp.allclose(out, ref, atol=1e-5, rtol=1e-5), "mismatch vs reference"

    print("KERNEL_OK")
</pallas_src>

<mosaic_0001>
module attributes {stable_mosaic.version = 11 : i64} {
  func.func @_sparsification_kernel(%arg0: i32, %arg1: memref<16x32xf32, #tpu.memory_space<vmem>>, %arg2: memref<32x64xf32, #tpu.memory_space<vmem>>, %arg3: memref<1x64xf32, #tpu.memory_space<vmem>>, %arg4: memref<64x32xf32, #tpu.memory_space<vmem>>, %arg5: memref<1x32xf32, #tpu.memory_space<vmem>>, %arg6: memref<16x16xf32, #tpu.memory_space<vmem>>) attributes {dimension_semantics = [#tpu.dimension_semantics<parallel>], iteration_bounds = array<i64: 1>, scalar_prefetch = 0 : i64, scratch_operands = 0 : i64, tpu.core_type = #tpu.core_type<tc>, window_params = [{transform_indices = @transform_0, window_bounds = array<i64: 16, 32>}, {pipeline_mode = #tpu.pipeline_mode<synchronous>, transform_indices = @transform_1, window_bounds = array<i64: 32, 64>}, {pipeline_mode = #tpu.pipeline_mode<synchronous>, transform_indices = @transform_2, window_bounds = array<i64: 1, 64>}, {pipeline_mode = #tpu.pipeline_mode<synchronous>, transform_indices = @transform_3, window_bounds = array<i64: 64, 32>}, {pipeline_mode = #tpu.pipeline_mode<synchronous>, transform_indices = @transform_4, window_bounds = array<i64: 1, 32>}, {transform_indices = @transform_5, window_bounds = array<i64: 16, 16>}]} {
    %c0 = arith.constant 0 : index
    %c0_0 = arith.constant 0 : index
    %0 = vector.load %arg1[%c0, %c0_0] : memref<16x32xf32, #tpu.memory_space<vmem>>, vector<16x32xf32>
    %c0_1 = arith.constant 0 : index
    %c0_2 = arith.constant 0 : index
    %1 = vector.load %arg2[%c0_1, %c0_2] : memref<32x64xf32, #tpu.memory_space<vmem>>, vector<32x64xf32>
    %cst = arith.constant dense<0.000000e+00> : vector<16x64xf32>
    %2 = tpu.matmul %0, %1, %cst {dimension_numbers = #tpu.dot_dimension_numbers<[1], [0], [0], [1], [0, 0, 1, 1], [], []>} : vector<16x32xf32>, vector<32x64xf32>, vector<16x64xf32> -> vector<16x64xf32>
    %c0_3 = arith.constant 0 : index
    %c0_4 = arith.constant 0 : index
    %3 = vector.load %arg3[%c0_3, %c0_4] : memref<1x64xf32, #tpu.memory_space<vmem>>, vector<1x64xf32>
    %4 = vector.broadcast %3 : vector<1x64xf32> to vector<16x64xf32>
    %5 = arith.addf %2, %4 : vector<16x64xf32>
    %cst_5 = arith.constant 0.000000e+00 : f32
    %6 = vector.broadcast %cst_5 : f32 to vector<16x64xf32>
    %7 = arith.maximumf %5, %6 : vector<16x64xf32>
    %c0_6 = arith.constant 0 : index
    %c0_7 = arith.constant 0 : index
    %8 = vector.load %arg4[%c0_6, %c0_7] : memref<64x32xf32, #tpu.memory_space<vmem>>, vector<64x32xf32>
    %cst_8 = arith.constant dense<0.000000e+00> : vector<16x32xf32>
    %9 = tpu.matmul %7, %8, %cst_8 {dimension_numbers = #tpu.dot_dimension_numbers<[1], [0], [0], [1], [0, 0, 1, 1], [], []>} : vector<16x64xf32>, vector<64x32xf32>, vector<16x32xf32> -> vector<16x32xf32>
    %c0_9 = arith.constant 0 : index
    %c0_10 = arith.constant 0 : index
    %10 = vector.load %arg5[%c0_9, %c0_10] : memref<1x32xf32, #tpu.memory_space<vmem>>, vector<1x32xf32>
    %11 = vector.broadcast %10 : vector<1x32xf32> to vector<16x32xf32>
    %12 = arith.addf %9, %11 : vector<16x32xf32>
    %cst_11 = arith.constant 0.000000e+00 : f32
    %13 = vector.broadcast %cst_11 : f32 to vector<16x32xf32>
    %14 = arith.maximumf %12, %13 : vector<16x32xf32>
    %15 = vector.extract_strided_slice %14 {offsets = [0, 16], sizes = [16, 16], strides = [1, 1]} : vector<16x32xf32> to vector<16x16xf32>
    %16 = vector.extract_strided_slice %14 {offsets = [0, 0], sizes = [16, 16], strides = [1, 1]} : vector<16x32xf32> to vector<16x16xf32>
    %17 = arith.mulf %15, %16 : vector<16x16xf32>
    %c0_12 = arith.constant 0 : index
    %c0_13 = arith.constant 0 : index
    %18 = vector.load %arg6[%c0_12, %c0_13] : memref<16x16xf32, #tpu.memory_space<vmem>>, vector<16x16xf32>
    tpu.vector_store %arg6[%c0_12, %c0_13], %17 {strides = array<i32>} : memref<16x16xf32, #tpu.memory_space<vmem>>, vector<16x16xf32>,
    return
  }
  func.func @transform_0(%arg0: i32) -> (i32, i32) {
    %c0_i32 = arith.constant 0 : i32
    %c0_i32_0 = arith.constant 0 : i32
    return %arg0, %c0_i32 : i32, i32
  }
  func.func @transform_1(%arg0: i32) -> (i32, i32) {
    %c0_i32 = arith.constant 0 : i32
    %c0_i32_0 = arith.constant 0 : i32
    %c0_i32_1 = arith.constant 0 : i32
    return %c0_i32, %c0_i32_0 : i32, i32
  }
  func.func @transform_2(%arg0: i32) -> (i32, i32) {
    %c0_i32 = arith.constant 0 : i32
    %c0_i32_0 = arith.constant 0 : i32
    %c0_i32_1 = arith.constant 0 : i32
    return %c0_i32, %c0_i32_0 : i32, i32
  }
  func.func @transform_3(%arg0: i32) -> (i32, i32) {
    %c0_i32 = arith.constant 0 : i32
    %c0_i32_0 = arith.constant 0 : i32
    %c0_i32_1 = arith.constant 0 : i32
    return %c0_i32, %c0_i32_0 : i32, i32
  }
  func.func @transform_4(%arg0: i32) -> (i32, i32) {
    %c0_i32 = arith.constant 0 : i32
    %c0_i32_0 = arith.constant 0 : i32
    %c0_i32_1 = arith.constant 0 : i32
    return %c0_i32, %c0_i32_0 : i32, i32
  }
  func.func @transform_5(%arg0: i32) -> (i32, i32) {
    %c0_i32 = arith.constant 0 : i32
    %c0_i32_0 = arith.constant 0 : i32
    return %arg0, %c0_i32 : i32, i32
  }
}

</mosaic_0001>

<bundles_post_ra>
// kernel: tpu_custom_call.1
= control target key start
LH: loop header
LB: loop body
LE: loop exit
PB: predicated region body
PF: predicated region fallthrough
CT: control target
= control target key end

     0   :  { %s281_s0 = inlined_call_operand.vmem [shape: f32[16,32], index: 0, kind: input, shape index: {}]   ;;  %s282_s1 = inlined_call_operand.vmem [shape: f32[32,64], index: 1, kind: input, shape index: {}]   ;;  %s283_s2 = inlined_call_operand.vmem [shape: f32[1,64], index: 2, kind: input, shape index: {}]   ;;  %s284_s3 = inlined_call_operand.vmem [shape: f32[64,32], index: 3, kind: input, shape index: {}]   ;;  %s285_s4 = inlined_call_operand.vmem [shape: f32[1,32], index: 4, kind: input, shape index: {}]   ;;  %s286_s5 = inlined_call_operand.hbm [shape: f32[16,16], index: 5, kind: output, shape index: {}]  }
   0x1   :  { %v26_v0 = vld [vmem:[%s282_s1 + $0x18] sm:$0xff]  ;;  %v25_v1 = vld [vmem:[%s282_s1 + $0x10] sm:$0xff]  ;;  %v24_v2 = vld [vmem:[%s282_s1 + $0x8] sm:$0xff] }
   0x2   :  { %50 = vmatpush.msra.mxu0 %v26_v0  ;;  %150 = vmatpush.msra.mxu3 %v26_v0  ;;  %v70_v3 = vld [vmem:[%s284_s3 + $0x38] sm:$0xff]  ;;  %v69_v4 = vld [vmem:[%s284_s3 + $0x30] sm:$0xff]  ;;  %v23_v5 = vld [vmem:[%s282_s1] sm:$0xff] }
   0x3   :  { %90 = vmatpush.msra.mxu1 %v70_v3  ;;  %154 = vmatpush.msra.mxu2 %v70_v3 }
   0x4   :  { %51 = vmatpush.msra.mxu0 %v25_v1  ;;  %151 = vmatpush.msra.mxu3 %v25_v1 }
   0x5   :  { %10 = vsyncpa [#allocation3], 0  ;;  %v21_v6 = vld [vmem:[%s281_s0] sm:$0xff]  ;;  %vm31_vm0 = vcmask 261120   ;;  %v22_v7 = vld [vmem:[%s281_s0 + $0x8] sm:$0xff]  ;;  %91 = vmatpush.msra.mxu1 %v69_v4  ;;  %155 = vmatpush.msra.mxu2 %v69_v4  ;;  %vm75_vm1 = vcmask 523264  }
   0x6   :  { %52 = vmatpush.msra.mxu0 %v24_v2  ;;  %152 = vmatpush.msra.mxu3 %v24_v2  ;;  %v68_v8 = vld [vmem:[%s284_s3 + $0x28] sm:$0xff]  ;;  %v67_v9 = vld [vmem:[%s284_s3 + $0x20] sm:$0xff]  ;;  %v66_v10 = vld [vmem:[%s284_s3 + $0x18] sm:$0xff]  ;;  %vm125_vm2 = vcmask 130048   ;;  %s134_s26 = sshll.u32 %s286_s5, 4  ;;  %s198_s27 = smov 128   ;;  %s135_s26 = int_to_ptr.hbm [resolvable:$true] %s134_s26 }
   0x7   :  { %92 = vmatpush.msra.mxu1 %v68_v8  ;;  %156 = vmatpush.msra.mxu2 %v68_v8  ;;  %v65_v11 = vld [vmem:[%s284_s3 + $0x10] sm:$0xff]  ;;  %v64_v12 = vld [vmem:[%s284_s3 + $0x8] sm:$0xff]  ;;  %v63_v13 = vld [vmem:[%s284_s3] sm:$0xff]  ;;  %s195_s3 = smov 16   ;;  %s199_s28 = smov 8  }
   0x8   :  { %53 = vmatpush.msra.mxu0 %v23_v5  ;;  %153 = vmatpush.msra.mxu3 %v23_v5  ;;  %v167_v14 = vld [vmem:[%s283_s2] ss:$0 sm:$0xff]  ;;  %s196_s2 = smov 112  }
   0x9   :  { %146 = vmatmul.msk.f32.vlgmr.msra.gmra.mxu0 %vm31_vm0, %v21_v6  ;;  %147 = vmatmul.msk.f32.vlgmr.msra.gmra.mxu3 %vm31_vm0, %v22_v7  ;;  %v168_v21 = vld [vmem:[%s285_s4] ss:$0 sm:$0xff]  ;;  %s197_s4 = smov [#allocation2]  }
   0xa   :  { %93 = vmatpush.msra.mxu1 %v67_v9  ;;  %157 = vmatpush.msra.mxu2 %v67_v9  ;;  %s132_s23 = sshll.u32 %s197_s4, 4  ;;  %s133_s23 = int_to_ptr.vmem [resolvable:$true] %s132_s23 }
   0xc   :  { %94 = vmatpush.msra.mxu1 %v66_v10  ;;  %158 = vmatpush.msra.mxu2 %v66_v10 }
   0xe   :  { %95 = vmatpush.msra.mxu1 %v65_v11  ;;  %159 = vmatpush.msra.mxu2 %v65_v11 }
  0x10   :  { %96 = vmatpush.msra.mxu1 %v64_v12  ;;  %160 = vmatpush.msra.mxu2 %v64_v12 }
  0x12   :  { %97 = vmatpush.msra.mxu1 %v63_v13  ;;  %161 = vmatpush.msra.mxu2 %v63_v13 }
  0x86   :  { %v55_v15 = vpop.f32.mrf.mxu0 }
  0x87   :  { %v56_v16 = vadd.f32 %v167_v14, %v55_v15 }
  0x89   :  { %v61_v17 = vmax.f32 %v56_v16, 0.0 }
  0x8b   :  { %148 = vmatmul.msk.f32.vlgmr.msra.gmra.mxu1 %vm75_vm1, %v61_v17 }
  0x8c   :  { %v58_v18 = vpop.f32.mrf.mxu3 }
  0x8d   :  { %v59_v19 = vadd.f32 %v167_v14, %v58_v18 }
  0x8f   :  { %v62_v20 = vmax.f32 %v59_v19, 0.0 }
  0x91   :  { %149 = vmatmul.msk.f32.vlgmr.msra.gmra.mxu2 %vm75_vm1, %v62_v20 }
 0x108   :  { %v99_v22 = vpop.f32.mrf.mxu1 }
 0x109   :  { %v100_v23 = vadd.f32 %v168_v21, %v99_v22 }
 0x10b   :  { %v105_v24 = vmax.f32 %v100_v23, 0.0 }
 0x10d   :  { %109 = vrot.lane.b32.xlu0 %v105_v24, %s195_s3 }
 0x114   :  { %v102_v25 = vpop.f32.mrf.mxu2 }
 0x115   :  { %v103_v26 = vadd.f32 %v168_v21, %v102_v25 }
 0x117   :  { %v106_v27 = vmax.f32 %v103_v26, 0.0 }
 0x119   :  { %111 = vrot.lane.b32.xlu0 %v106_v27, %s195_s3 }
 0x17f   :  { %v110_v28 = vpop.permute.xlu0 %109 }
 0x180   :  { %v115_v29 = vmul.f32 %v110_v28, %v105_v24 }
 0x182   :  { %119 = vrot.lane.b32.xlu1 %v115_v29, %s196_s2 }
 0x18b   :  { %v112_v30 = vpop.permute.xlu0 %111 }
 0x18c   :  { %v116_v31 = vmul.f32 %v112_v30, %v106_v27 }
 0x18e   :  { %121 = vrot.lane.b32.xlu1 %v116_v31, %s196_s2 }
 0x1f4   :  { %v120_v32 = vpop.permute.xlu1 %119 }
 0x1f5   :  { %126 = vst.msk [vmem:[#allocation2] sm:$0xff] %vm125_vm2, %v120_v32 }
 0x200   :  { %v122_v33 = vpop.permute.xlu1 %121 }
 0x201   :  { %127 = vst.msk [vmem:[#allocation2 + $0x8] sm:$0xff] %vm125_vm2, %v122_v33 }
 0x202   :  { %140 = dma.vmem_to_hbm [thread:$0]  %s133_s23, 256, %s135_s26, [#allocation3], %s198_s27, %s198_s27, %s199_s28  }
 0x203   :  { %193 = dma.done.wait [#allocation3], 256  }
 0x204   :  { %194 = vsyncadd [#allocation3], 4294967040 }
 0x205   :  { %145 = vsyncpa [#allocation3], 1 }

</bundles_post_ra>
